<compile_context>
chip_gen: v7x
topology: tpu7x:2x2x1
jax: 0.10.0
libtpu: 0.0.40
codegen_flags: <defaults>
</compile_context>

<pallas_src>
import jax
import jax.numpy as jnp
from jax.experimental import pallas as pl
from jax.experimental.pallas import tpu as pltpu


# ---------------------------------------------------------------------------
# Pallas kernel: conv-as-matmul (+ folded bias & 1/HW) -> ReLU -> GAP partial
# sums accumulated into the resident output block.
# ---------------------------------------------------------------------------
def _conv_gap_kernel(patches_ref, wcb_ref, feats_ref):
    # patches_ref: (TN, HW_C, CK1) bf16  im2col patches + ones column
    # wcb_ref:     (CK1, F_PAD)    bf16  conv weight + bias row, pre-scaled 1/HW
    # feats_ref:   (TN, F_PAD)     f32   resident GAP accumulator / output
    j = pl.program_id(1)

    @pl.when(j == 0)
    def _init():
        feats_ref[...] = jnp.zeros_like(feats_ref)

    tn, hw_c, ck1 = patches_ref.shape
    f_pad = feats_ref.shape[-1]

    # Conv2d(3x3, pad=1) + bias for this spatial chunk as one MXU matmul
    # (bf16 operands, f32 accumulate).  The 1/HW GAP scale is folded into wcb.
    p = patches_ref[...].reshape(tn * hw_c, ck1)
    z = jnp.dot(p, wcb_ref[...], preferred_element_type=jnp.float32)
    z = jnp.maximum(z, 0.0)                                  # (tn*hw_c, f_pad)

    # Partial global-average-pool: sublane-direction sum over this chunk's
    # spatial positions (F on lanes), accumulated into the resident output.
    feats_ref[...] += jnp.sum(z.reshape(tn, hw_c, f_pad), axis=1)


# ---------------------------------------------------------------------------
# Tiling helpers
# ---------------------------------------------------------------------------
def _pick_instance_tile(n, tn_max=64):
    tn = max(1, min(tn_max, n))
    if tn > 8:
        tn -= tn % 8                     # multiple of 8 -> clean sublane tiling
    # Keep >=2 instance tiles when N allows so the "parallel" axis feeds both
    # v7x TensorCores; per-step work stays well above the ~0.35us overhead.
    while tn > 8 and pl.cdiv(n, tn) < 2:
        tn //= 2
    return tn


def _pick_hw_chunk(hw, max_chunk=64):
    for cand in (64, 32, 16, 8):
        if cand <= max_chunk and hw % cand == 0:
            return cand
    return hw


# ---------------------------------------------------------------------------
# Forward wrapper
# ---------------------------------------------------------------------------
def iclassifier_forward(x, conv_w, conv_b, fc_w, fc_b):
    """x: (N, C, H, W) f32 (NCHW).  conv_w: (F, C, 3, 3), conv_b: (F,),
    fc_w: (O, F), fc_b: (O,).  Returns (feats (N, F), c (N, O))."""
    N, C, H, W = x.shape
    F = conv_w.shape[0]
    HW = H * W
    CK = C * 9
    CK1 = CK + 1                                   # + ones column (bias fold)
    F_pad = ((F + 127) // 128) * 128

    tn = _pick_instance_tile(N)
    n_pad = pl.cdiv(N, tn) * tn
    hw_c = _pick_hw_chunk(HW)

    # ---- XLA-side im2col for the 3x3 / pad=1 conv (layout plumbing). -------
    # Flattening order is (c, kh, kw), c-major, matching conv_w.reshape(F, C*9).
    xp = jnp.pad(x, ((0, n_pad - N), (0, 0), (1, 1), (1, 1)))
    cols = [xp[:, :, ki:ki + H, kj:kj + W] for ki in range(3) for kj in range(3)]
    patches = jnp.stack(cols, axis=2)              # (N_pad, C, 9, H, W)
    patches = patches.transpose(0, 3, 4, 1, 2)     # (N_pad, H, W, C, 9)
    patches = patches.reshape(n_pad, HW, CK).astype(jnp.bfloat16)
    patches = jnp.concatenate(                     # ones column for bias fold
        [patches, jnp.ones((n_pad, HW, 1), jnp.bfloat16)], axis=-1)

    # Conv weight + bias in matmul form; 1/HW GAP scale folded in (exact for
    # power-of-two HW, and the reference below mirrors this quantization);
    # F zero-padded to a lane-dense F_pad (pad columns sliced off afterwards).
    wcb = jnp.concatenate([conv_w.reshape(F, CK).T, conv_b[None, :]], axis=0)
    wcb = wcb * (1.0 / HW)
    wcb = jnp.pad(wcb, ((0, 0), (0, F_pad - F))).astype(jnp.bfloat16)

    # VMEM working set at tn=64/hw_c=64 is ~6-12 MiB (2x lane-padded patch
    # buffers + f32 conv chunk temp + output block); cap sized for v7x (64 MiB
    # physical) so no per-generation fork is needed.
    vmem_limit = 28 * 1024 * 1024

    feats_p = pl.pallas_call(
        _conv_gap_kernel,
        out_shape=jax.ShapeDtypeStruct((n_pad, F_pad), jnp.float32),
        grid_spec=pltpu.PrefetchScalarGridSpec(
            num_scalar_prefetch=0,
            grid=(n_pad // tn, HW // hw_c),
            in_specs=[
                pl.BlockSpec((tn, hw_c, CK1), lambda i, j: (i, j, 0)),  # patches
                pl.BlockSpec((CK1, F_pad), lambda i, j: (0, 0)),        # weights
            ],
            out_specs=pl.BlockSpec((tn, F_pad), lambda i, j: (i, 0)),
        ),
        compiler_params=pltpu.CompilerParams(
            dimension_semantics=("parallel", "arbitrary"),
            vmem_limit_bytes=vmem_limit),
    )(patches, wcb)

    feats = feats_p[:N, :F]

    # fc head stays in XLA (negligible FLOPs; in-kernel would mean masked
    # 4-lane stores).  HIGHEST precision keeps it a true f32 matmul.
    c = (jnp.dot(feats, fc_w.T.astype(jnp.float32),
                 precision=jax.lax.Precision.HIGHEST)
         + fc_b[None, :].astype(jnp.float32))
    return feats, c


# ---------------------------------------------------------------------------
# Pure-JAX reference (mirrors the PyTorch forward) for correctness checking
# ---------------------------------------------------------------------------
def _reference(x, conv_w, conv_b, fc_w, fc_b):
    conv = jax.lax.conv_general_dilated(
        x, conv_w, window_strides=(1, 1), padding=((1, 1), (1, 1)),
        dimension_numbers=("NCHW", "OIHW", "NCHW"),
        precision=jax.lax.Precision.HIGHEST)
    conv = jnp.maximum(conv + conv_b[None, :, None, None], 0.0)
    feats = jnp.mean(conv, axis=(2, 3))            # global avg pool -> (N, F)
    c = jnp.dot(feats, fc_w.T, precision=jax.lax.Precision.HIGHEST) + fc_b[None, :]
    return feats, c


if __name__ == "__main__":
    # Small shapes consistent with the module: a bag of N instances of CxHxW.
    N, C, H, W = 16, 4, 16, 16
    feature_size, output_class = 32, 4

    key = jax.random.PRNGKey(0)
    kx, kcw, kcb, kfw, kfb = jax.random.split(key, 5)

    x = jax.random.normal(kx, (N, C, H, W), dtype=jnp.float32)

    # Deterministic parameter init (PyTorch-style uniform +-1/sqrt(fan_in)).
    conv_fan_in = C * 3 * 3
    conv_w = jax.random.uniform(kcw, (feature_size, C, 3, 3), jnp.float32,
                                -1.0, 1.0) / jnp.sqrt(conv_fan_in)
    conv_b = jax.random.uniform(kcb, (feature_size,), jnp.float32,
                                -1.0, 1.0) / jnp.sqrt(conv_fan_in)
    fc_w = jax.random.uniform(kfw, (output_class, feature_size), jnp.float32,
                              -1.0, 1.0) / jnp.sqrt(feature_size)
    fc_b = jax.random.uniform(kfb, (output_class,), jnp.float32,
                              -1.0, 1.0) / jnp.sqrt(feature_size)

    fwd = jax.jit(iclassifier_forward)
    feats, c = fwd(x, conv_w, conv_b, fc_w, fc_b)
    jax.block_until_ready((feats, c))

    # Reference on operands quantized exactly the way the kernel quantizes them
    # (bf16 MXU operands with the 1/HW scale folded in; f32 accumulation).
    hw = float(H * W)
    xq = x.astype(jnp.bfloat16).astype(jnp.float32)
    wq = (conv_w / hw).astype(jnp.bfloat16).astype(jnp.float32) * hw
    bq = (conv_b / hw).astype(jnp.bfloat16).astype(jnp.float32) * hw
    feats_ref, c_ref = _reference(xq, wq, bq, fc_w, fc_b)

    assert feats.shape == (N, feature_size) and c.shape == (N, output_class)
    assert jnp.allclose(feats, feats_ref, atol=1e-3, rtol=1e-3)
    assert jnp.allclose(c, c_ref, atol=1e-3, rtol=1e-3)

    print("KERNEL_OK")
</pallas_src>

<mosaic_0001>
module attributes {stable_mosaic.version = 11 : i64} {
  func.func @_conv_gap_kernel(%arg0: i32, %arg1: i32, %arg2: memref<8x64x37xbf16, #tpu.memory_space<vmem>>, %arg3: memref<37x128xbf16, #tpu.memory_space<vmem>>, %arg4: memref<8x128xf32, #tpu.memory_space<vmem>>) attributes {dimension_semantics = [#tpu.dimension_semantics<parallel>, #tpu.dimension_semantics<arbitrary>], iteration_bounds = array<i64: 2, 4>, scalar_prefetch = 0 : i64, scratch_operands = 0 : i64, tpu.core_type = #tpu.core_type<tc>, window_params = [{transform_indices = @transform_0, window_bounds = array<i64: 8, 64, 37>}, {pipeline_mode = #tpu.pipeline_mode<synchronous>, transform_indices = @transform_1, window_bounds = array<i64: 37, 128>}, {transform_indices = @transform_2, window_bounds = array<i64: 8, 128>}]} {
    %c0_i32 = arith.constant 0 : i32
    %0 = arith.cmpi eq, %arg1, %c0_i32 : i32
    %1 = arith.extui %0 : i1 to i32
    %c0_i32_0 = arith.constant 0 : i32
    %2 = arith.cmpi ne, %1, %c0_i32_0 : i32
    scf.if %2 {
      %cst_11 = arith.constant 0.000000e+00 : f32
      %14 = vector.broadcast %cst_11 : f32 to vector<8x128xf32>
      %c0_12 = arith.constant 0 : index
      %c0_13 = arith.constant 0 : index
      %15 = vector.load %arg4[%c0_12, %c0_13] : memref<8x128xf32, #tpu.memory_space<vmem>>, vector<8x128xf32>
      tpu.vector_store %arg4[%c0_12, %c0_13], %14 {strides = array<i32>} : memref<8x128xf32, #tpu.memory_space<vmem>>, vector<8x128xf32>,
    } else {
    }
    %c0 = arith.constant 0 : index
    %c0_1 = arith.constant 0 : index
    %c0_2 = arith.constant 0 : index
    %3 = vector.load %arg2[%c0, %c0_1, %c0_2] : memref<8x64x37xbf16, #tpu.memory_space<vmem>>, vector<8x64x37xbf16>
    %4 = vector.shape_cast %3 : vector<8x64x37xbf16> to vector<512x37xbf16>
    %c0_3 = arith.constant 0 : index
    %c0_4 = arith.constant 0 : index
    %5 = vector.load %arg3[%c0_3, %c0_4] : memref<37x128xbf16, #tpu.memory_space<vmem>>, vector<37x128xbf16>
    %cst = arith.constant dense<0.000000e+00> : vector<512x128xf32>
    %6 = tpu.matmul %4, %5, %cst {dimension_numbers = #tpu.dot_dimension_numbers<[1], [0], [0], [1], [0, 0, 1, 1], [], []>} : vector<512x37xbf16>, vector<37x128xbf16>, vector<512x128xf32> -> vector<512x128xf32>
    %cst_5 = arith.constant 0.000000e+00 : f32
    %7 = vector.broadcast %cst_5 : f32 to vector<512x128xf32>
    %8 = arith.maximumf %6, %7 : vector<512x128xf32>
    %c0_6 = arith.constant 0 : index
    %c0_7 = arith.constant 0 : index
    %9 = vector.load %arg4[%c0_6, %c0_7] : memref<8x128xf32, #tpu.memory_space<vmem>>, vector<8x128xf32>
    %10 = vector.shape_cast %8 : vector<512x128xf32> to vector<8x64x128xf32>
    %cst_8 = arith.constant dense<0.000000e+00> : vector<8x128xf32>
    %11 = vector.multi_reduction <add>, %10, %cst_8 [1] : vector<8x64x128xf32> to vector<8x128xf32>
    %12 = arith.addf %9, %11 : vector<8x128xf32>
    %c0_9 = arith.constant 0 : index
    %c0_10 = arith.constant 0 : index
    %13 = vector.load %arg4[%c0_9, %c0_10] : memref<8x128xf32, #tpu.memory_space<vmem>>, vector<8x128xf32>
    tpu.vector_store %arg4[%c0_9, %c0_10], %12 {strides = array<i32>} : memref<8x128xf32, #tpu.memory_space<vmem>>, vector<8x128xf32>,
    return
  }
  func.func @transform_0(%arg0: i32, %arg1: i32) -> (i32, i32, i32) {
    %c0_i32 = arith.constant 0 : i32
    %c0_i32_0 = arith.constant 0 : i32
    return %arg0, %arg1, %c0_i32 : i32, i32, i32
  }
  func.func @transform_1(%arg0: i32, %arg1: i32) -> (i32, i32) {
    %c0_i32 = arith.constant 0 : i32
    %c0_i32_0 = arith.constant 0 : i32
    %c0_i32_1 = arith.constant 0 : i32
    return %c0_i32, %c0_i32_0 : i32, i32
  }
  func.func @transform_2(%arg0: i32, %arg1: i32) -> (i32, i32) {
    %c0_i32 = arith.constant 0 : i32
    %c0_i32_0 = arith.constant 0 : i32
    return %arg0, %c0_i32 : i32, i32
  }
}

</mosaic_0001>

<bundles_post_ra>
// kernel: iclassifier_forward.1
= control target key start
LH: loop header
LB: loop body
LE: loop exit
PB: predicated region body
PF: predicated region fallthrough
CT: control target
= control target key end

     0   :  { %s1725_s9 = smov 0   ;;  %s1727_s10 = smov 0   ;;  %s1971_s0 = inlined_call_operand.vmem [shape: bf16[16,256,37], index: 0, kind: input, shape index: {}]   ;;  %s1972_s1 = inlined_call_operand.vmem [shape: bf16[37,128], index: 1, kind: input, shape index: {}]   ;;  %s1973_s2 = inlined_call_operand.vmem [shape: f32[16,128], index: 2, kind: output, shape index: {}]  }
   0x1   :  { %s1729_s11 = smov 0   ;;  %s1731_s12 = smov 0  }
   0x2   :  { %s1733_s13 = smov 0   ;;  %s1735_s14 = smov 0  }
   0x3   :  { %s1737_s15 = smov 0  }
   0x4 LB: > { %s21_s16 = sadd.s32 1, %s1698_s13  ;;  %s24_s17 = sadd.s32 1, %s1702_s14  ;;  %s1706_s15 = sphi %s1737_s15, %s12_s15   ;;  %s1702_s14 = sphi %s1735_s14, %s1979_s14   ;;  %s1698_s13 = sphi %s1733_s13, %s1978_s13   ;;  %s1694_s12 = sphi %s1731_s12, %s1977_s12   ;;  %s1690_s11 = sphi %s1729_s11, %s1976_s11   ;;  %s1686_s10 = sphi %s1727_s10, %s1975_s10   ;;  %s1682_s9 = sphi %s1725_s9, %s1974_s9  }
   0x5   : > { %p22_p0 = scmp.ge.s32.totalorder %s21_s16, 4  ;;  %p40_p1 = scmp.ne.s32.totalorder %s1686_s10, %s1682_s9 }
   0x6   : > { %p41_p2 = scmp.eq.s32.totalorder %s1706_s15, 0  ;;  %s33_s21 = sadd.s32 1, %s1686_s10 }
   0x7   : > { %s1981_s16 = smov (%p22_p0, %s21_s16), 0  ;;  %s1983_s17 = smov (!%p22_p0, %s24_s17), %s1702_s14 }
   0x8   : > { %p42_p3 = por %p41_p2, %p40_p1  ;;  %p26_p4 = scmp.ge.s32.totalorder %s1983_s17, 2 }
   0x9   : > { %s29_s18 = ssub.s32 %s1698_s13, %s1981_s16  ;;  %p1368_p6 = scmp.ge.s32.totalorder %s1706_s15, 8 }
   0xa   : > { %s1985_s17 = smov (%p26_p4, %s1983_s17), 0 }
   0xb   : > { %s28_s19 = ssub.s32 %s1702_s14, %s1985_s17  ;;  %116 = sbr.rel (%p1368_p6) target bundleno = 41 (0x29), region = 20 }
   0xc   : > { %s30_s20 = sor.u32 %s29_s18, %s28_s19 }
   0xd   : > { %p31_p5 = scmp.eq.s32.totalorder %s30_s20, 0 }
   0xf   : > { %s1776_s22 = scalar_select %p31_p5, %s1686_s10, %s33_s21  }
  0x12   : > { %119 = sbr.rel (!%p42_p3) target bundleno = 41 (0x29), region = 24  ;;  %s121_s23 = sand.u32 (%p42_p3), 1, %s1686_s10  }
  0x13   : > { %s1371_s24 = sshll.u32 (%p42_p3), %s1698_s13, 3  ;;  %s1369_s25 = sshll.u32 (%p42_p3), %s121_s23, 8 }
  0x14   : > { %s1447_s26 = sshll.u32 (%p42_p3), %s1702_s14, 8  ;;  %s1790_s4 = scalar_lea.vmem (%p42_p3), [#allocation2], %s1369_s25 }
  0x15   : > { %s127_s27 = sadd.s32 (%p42_p3), %s1447_s26, %s1371_s24 }
  0x16   : > { %s1373_s28 = sshll.u32 (%p42_p3), %s127_s27, 2 }
  0x17   : > { %s1785_s3 = scalar_lea.vmem (%p42_p3), %s1971_s0, %s1373_s28 }
  0x18   : > { %v145_v0 = vld [vmem:[%s1785_s3] sm:$0xff] (%p42_p3)   ;;  %v149_v1 = vld [vmem:[%s1785_s3 + $0x8] sm:$0xff] (%p42_p3)   ;;  %v153_v2 = vld [vmem:[%s1785_s3 + $0x10] sm:$0xff] (%p42_p3)  }
  0x19   : > { %146 = vst [vmem:[%s1790_s4] sm:$0xff] %v145_v0   ;;  %150 = vst [vmem:[%s1790_s4 + $0x8] sm:$0xff] %v149_v1   ;;  %v157_v3 = vld [vmem:[%s1785_s3 + $0x18] sm:$0xff]   ;;  %v161_v4 = vld [vmem:[%s1785_s3 + $0x80] sm:$0xff]  }
  0x1a   : > { %154 = vst [vmem:[%s1790_s4 + $0x10] sm:$0xff] %v153_v2   ;;  %v165_v5 = vld [vmem:[%s1785_s3 + $0x88] sm:$0xff]   ;;  %158 = vst [vmem:[%s1790_s4 + $0x18] sm:$0xff] %v157_v3   ;;  %v169_v6 = vld [vmem:[%s1785_s3 + $0x90] sm:$0xff]  }
  0x1b   : > { %162 = vst [vmem:[%s1790_s4 + $0x20] sm:$0xff] %v161_v4   ;;  %166 = vst [vmem:[%s1790_s4 + $0x28] sm:$0xff] %v165_v5   ;;  %v173_v7 = vld [vmem:[%s1785_s3 + $0x98] sm:$0xff]   ;;  %v177_v8 = vld [vmem:[%s1785_s3 + $0x100] sm:$0xff]  }
  0x1c   : > { %170 = vst [vmem:[%s1790_s4 + $0x30] sm:$0xff] %v169_v6   ;;  %174 = vst [vmem:[%s1790_s4 + $0x38] sm:$0xff] %v173_v7   ;;  %v181_v9 = vld [vmem:[%s1785_s3 + $0x108] sm:$0xff]   ;;  %v185_v10 = vld [vmem:[%s1785_s3 + $0x110] sm:$0xff]  }
  0x1d   : > { %178 = vst [vmem:[%s1790_s4 + $0x40] sm:$0xff] %v177_v8   ;;  %v189_v11 = vld [vmem:[%s1785_s3 + $0x118] sm:$0xff]   ;;  %182 = vst [vmem:[%s1790_s4 + $0x48] sm:$0xff] %v181_v9   ;;  %v193_v12 = vld [vmem:[%s1785_s3 + $0x180] sm:$0xff]  }
  0x1e   : > { %186 = vst [vmem:[%s1790_s4 + $0x50] sm:$0xff] %v185_v10   ;;  %190 = vst [vmem:[%s1790_s4 + $0x58] sm:$0xff] %v189_v11   ;;  %v197_v13 = vld [vmem:[%s1785_s3 + $0x188] sm:$0xff]   ;;  %v201_v14 = vld [vmem:[%s1785_s3 + $0x190] sm:$0xff]  }
  0x1f   : > { %194 = vst [vmem:[%s1790_s4 + $0x60] sm:$0xff] %v193_v12   ;;  %198 = vst [vmem:[%s1790_s4 + $0x68] sm:$0xff] %v197_v13   ;;  %v205_v15 = vld [vmem:[%s1785_s3 + $0x198] sm:$0xff]   ;;  %v209_v16 = vld [vmem:[%s1785_s3 + $0x200] sm:$0xff]  }
  0x20   : > { %202 = vst [vmem:[%s1790_s4 + $0x70] sm:$0xff] %v201_v14   ;;  %v213_v17 = vld [vmem:[%s1785_s3 + $0x208] sm:$0xff]   ;;  %206 = vst [vmem:[%s1790_s4 + $0x78] sm:$0xff] %v205_v15   ;;  %v217_v18 = vld [vmem:[%s1785_s3 + $0x210] sm:$0xff]  }
  0x21   : > { %210 = vst [vmem:[%s1790_s4 + $0x80] sm:$0xff] %v209_v16   ;;  %214 = vst [vmem:[%s1790_s4 + $0x88] sm:$0xff] %v213_v17   ;;  %v221_v19 = vld [vmem:[%s1785_s3 + $0x218] sm:$0xff]   ;;  %v225_v20 = vld [vmem:[%s1785_s3 + $0x280] sm:$0xff]  }
  0x22   : > { %218 = vst [vmem:[%s1790_s4 + $0x90] sm:$0xff] %v217_v18   ;;  %222 = vst [vmem:[%s1790_s4 + $0x98] sm:$0xff] %v221_v19   ;;  %v229_v21 = vld [vmem:[%s1785_s3 + $0x288] sm:$0xff]   ;;  %v233_v22 = vld [vmem:[%s1785_s3 + $0x290] sm:$0xff]  }
  0x23   : > { %226 = vst [vmem:[%s1790_s4 + $0xa0] sm:$0xff] %v225_v20   ;;  %v237_v23 = vld [vmem:[%s1785_s3 + $0x298] sm:$0xff]   ;;  %230 = vst [vmem:[%s1790_s4 + $0xa8] sm:$0xff] %v229_v21   ;;  %v241_v24 = vld [vmem:[%s1785_s3 + $0x300] sm:$0xff]  }
  0x24   : > { %234 = vst [vmem:[%s1790_s4 + $0xb0] sm:$0xff] %v233_v22   ;;  %238 = vst [vmem:[%s1790_s4 + $0xb8] sm:$0xff] %v237_v23   ;;  %v245_v25 = vld [vmem:[%s1785_s3 + $0x308] sm:$0xff]   ;;  %v249_v26 = vld [vmem:[%s1785_s3 + $0x310] sm:$0xff]  }
  0x25   : > { %242 = vst [vmem:[%s1790_s4 + $0xc0] sm:$0xff] %v241_v24   ;;  %246 = vst [vmem:[%s1790_s4 + $0xc8] sm:$0xff] %v245_v25   ;;  %v253_v27 = vld [vmem:[%s1785_s3 + $0x318] sm:$0xff]   ;;  %v257_v28 = vld [vmem:[%s1785_s3 + $0x380] sm:$0xff]  }
  0x26   : > { %250 = vst [vmem:[%s1790_s4 + $0xd0] sm:$0xff] %v249_v26   ;;  %v261_v29 = vld [vmem:[%s1785_s3 + $0x388] sm:$0xff]   ;;  %254 = vst [vmem:[%s1790_s4 + $0xd8] sm:$0xff] %v253_v27   ;;  %v265_v30 = vld [vmem:[%s1785_s3 + $0x390] sm:$0xff]  }
  0x27   : > { %258 = vst [vmem:[%s1790_s4 + $0xe0] sm:$0xff] %v257_v28   ;;  %262 = vst [vmem:[%s1790_s4 + $0xe8] sm:$0xff] %v261_v29   ;;  %v269_v31 = vld [vmem:[%s1785_s3 + $0x398] sm:$0xff]  }
  0x28   : > { %266 = vst [vmem:[%s1790_s4 + $0xf0] sm:$0xff] %v265_v30   ;;  %270 = vst [vmem:[%s1790_s4 + $0xf8] sm:$0xff] %v269_v31  }
  0x29 PF: > { %p1374_p7 = scmp.ge.s32.totalorder %s1706_s15, 1  ;;  %p422_p8 = scmp.lt.s32.totalorder %s1706_s15, 9 }
  0x2b   : > { %p423_p9 = pnand %p1374_p7, %p422_p8 }
  0x2c   : > { %s429_s5 = sand.u32 (!%p423_p9), 1, %s1682_s9   ;;  %p451_p10 = scmp.lt.s32.totalorder (!%p423_p9), %s1694_s12, 1 }
  0x2d   : > { %426 = sbr.rel (%p423_p9) target bundleno = 371 (0x173), region = 65  ;;  %s1375_s6 = sshll.u32 (!%p423_p9), %s429_s5, 8 }
  0x2e   : > { %s1863_s20 = scalar_lea.vmem (!%p423_p9), [#allocation2], %s1375_s6  ;;  %p1377_p11 = scmp.ne.s32.totalorder (!%p423_p9), %s1690_s11, 0 }
  0x34   : > { %s1987_s12 = smov (!%p451_p10, %s1694_s12), 1  ;;  %459 = sbr.rel (%p1377_p11) target bundleno = 59 (0x3b), region = 73 }
  0x35   : > { %s1376_s7 = sshll.u32 %s1987_s12, 3  ;;  %v1708_v32 = vmov (!%p1377_p11), 0.0  }
  0x36   : > { %s1861_s19 = scalar_lea.vmem %s1973_s2, %s1376_s7 }
  0x37   : > { %460 = vst [vmem:[%s1861_s19] sm:$0xff] (!%p1377_p11), %v1708_v32 }
  0x3b PF: > { %v1617_v33 = vld [vmem:[%s1972_s1] sm:$0xff]   ;;  %vm802_vm0 = vcmask 1041408   ;;  %v1618_v34 = vld [vmem:[%s1972_s1 + $0x8] sm:$0xff]   ;;  %vm803_vm1 = vcmask 1042432   ;;  %v1709_v36 = vmov 65535   ;;  %vm705_vm2 = vcmask 302080  }
  0x3c   : > { %1483 = vmatprep.subr.bf16.mxu0 %v1617_v33  ;;  %1553 = vmatprep.subr.bf16.mxu1 %v1617_v33  ;;  %v1619_v35 = vld [vmem:[%s1972_s1 + $0x10] ss:$0 sps:$4 sm:$0x77]   ;;  %v804_v37 = vsel %vm802_vm0, 4294967295, %v1709_v36  ;;  %v1620_v38 = vld [vmem:[%s1863_s20] sm:$0xff]   ;;  %v1622_v42 = vld [vmem:[%s1863_s20 + $0x8] sm:$0xff]  }
  0x3d   : > { %1484 = vmatpush3.bf16.msra.mxu0 %v1617_v33  ;;  %1556 = vmatpush3.bf16.msra.mxu1 %v1617_v33  ;;  %v805_v39 = vsel %vm803_vm1, %v804_v37, 0  ;;  %v1621_v41 = vld [vmem:[%s1863_s20 + $0x80] sm:$0xff]   ;;  %v1623_v43 = vld [vmem:[%s1863_s20 + $0x88] sm:$0xff]   ;;  %v1624_v44 = vld [vmem:[%s1863_s20 + $0x10] sm:$0xff]   ;;  %vm1275_vm3 = vcmask 1041409   ;;  %vm1277_vm4 = vcmask 1042434  }
  0x3e   : > { %1485 = vmatprep.subr.bf16.mxu0 %v1618_v34  ;;  %1554 = vmatprep.subr.bf16.mxu1 %v1618_v34  ;;  %v807_v40 = vand.u32 %v1619_v35, %v805_v39  ;;  %v1625_v45 = vld [vmem:[%s1863_s20 + $0x90] sm:$0xff]   ;;  %v1626_v46 = vld [vmem:[%s1863_s20 + $0x18] sm:$0xff]   ;;  %v1628_v48 = vld [vmem:[%s1863_s20 + $0x20] sm:$0xff]   ;;  %vm1279_vm5 = vcmask 1043459   ;;  %vm1281_vm6 = vcmask 1044484   ;;  %vm1283_vm7 = vcmask 1045509  }
  0x3f   : > { %1489 = vmatprep.mubr.msk.bf16.mxu0 %vm705_vm2, %v1620_v38  ;;  %1521 = vmatprep.mubr.msk.bf16.mxu1 %vm705_vm2, %v1621_v41  ;;  %v1627_v47 = vld [vmem:[%s1863_s20 + $0x98] sm:$0xff]   ;;  %v1629_v49 = vld [vmem:[%s1863_s20 + $0xa0] sm:$0xff]   ;;  %v1630_v50 = vld [vmem:[%s1863_s20 + $0x28] sm:$0xff]   ;;  %vm1285_vm8 = vcmask 1046534   ;;  %vm1287_vm9 = vcmask 1047559  }
  0x40   : > { %v1631_v51 = vld [vmem:[%s1863_s20 + $0xa8] sm:$0xff]   ;;  %v1632_v52 = vld [vmem:[%s1863_s20 + $0x30] sm:$0xff]   ;;  %v1634_v54 = vld [vmem:[%s1863_s20 + $0x38] sm:$0xff]  }
  0x41   : > { %1486 = vmatpush3.bf16.msra.mxu0 %v1618_v34  ;;  %1557 = vmatpush3.bf16.msra.mxu1 %v1618_v34  ;;  %v1633_v53 = vld [vmem:[%s1863_s20 + $0xb0] sm:$0xff]   ;;  %v1635_v55 = vld [vmem:[%s1863_s20 + $0xb8] sm:$0xff]   ;;  %v1636_v56 = vld [vmem:[%s1863_s20 + $0x40] sm:$0xff]  }
  0x42   : > { %1487 = vmatprep.subr.bf16.mxu0 %v807_v40  ;;  %1555 = vmatprep.subr.bf16.mxu1 %v807_v40  ;;  %v1637_v57 = vld [vmem:[%s1863_s20 + $0xc0] sm:$0xff]   ;;  %v1638_v58 = vld [vmem:[%s1863_s20 + $0x48] sm:$0xff]   ;;  %v1640_v60 = vld [vmem:[%s1863_s20 + $0x50] sm:$0xff]  }
  0x43   : > { %v1639_v59 = vld [vmem:[%s1863_s20 + $0xc8] sm:$0xff]   ;;  %v1641_v61 = vld [vmem:[%s1863_s20 + $0xd0] sm:$0xff]   ;;  %v1642_v62 = vld [vmem:[%s1863_s20 + $0x58] sm:$0xff]  }
  0x44   : > { %v1643_v63 = vld [vmem:[%s1863_s20 + $0xd8] sm:$0xff]   ;;  %v1644_v0 = vld [vmem:[%s1863_s20 + $0x60] sm:$0xff]   ;;  %v1646_v2 = vld [vmem:[%s1863_s20 + $0x68] sm:$0xff]  }
  0x45   : > { %1488 = vmatpush3.bf16.msra.mxu0 %v807_v40  ;;  %1558 = vmatpush3.bf16.msra.mxu1 %v807_v40  ;;  %v1645_v1 = vld [vmem:[%s1863_s20 + $0xe0] sm:$0xff]   ;;  %v1647_v3 = vld [vmem:[%s1863_s20 + $0xe8] sm:$0xff]   ;;  %v1648_v4 = vld [vmem:[%s1863_s20 + $0x70] sm:$0xff]  }
  0x46   : > { %v1649_v5 = vld [vmem:[%s1863_s20 + $0xf0] sm:$0xff]   ;;  %v1650_v6 = vld [vmem:[%s1863_s20 + $0x78] sm:$0xff]  }
  0x47   : > { %v1651_v7 = vld [vmem:[%s1863_s20 + $0xf8] sm:$0xff]  }
  0x48   : > { %1490 = vmatmul.mubr.msk.bf16.vlgmr.msra.gmra.mrb[0].mxu0 %vm705_vm2, %v1622_v42  ;;  %1522 = vmatmul.mubr.msk.bf16.vlgmr.msra.gmra.mrb[0].mxu1 %vm705_vm2, %v1623_v43 }
  0x49   : > { %1493 = vmatprep.mubr.msk.bf16.mxu0 %vm705_vm2, %v1624_v44  ;;  %1525 = vmatprep.mubr.msk.bf16.mxu1 %vm705_vm2, %v1625_v45 }
  0x50   : > { %1494 = vmatmul.mubr.msk.bf16.gmra.mrb[4].mxu0 %vm705_vm2, %v1626_v46  ;;  %1526 = vmatmul.mubr.msk.bf16.gmra.mrb[4].mxu1 %vm705_vm2, %v1627_v47 }
  0x51   : > { %1497 = vmatprep.mubr.msk.bf16.mxu0 %vm705_vm2, %v1628_v48  ;;  %1529 = vmatprep.mubr.msk.bf16.mxu1 %vm705_vm2, %v1629_v49 }
  0x58   : > { %1498 = vmatmul.mubr.msk.bf16.gmra.mrb[8].mxu0 %vm705_vm2, %v1630_v50  ;;  %1530 = vmatmul.mubr.msk.bf16.gmra.mrb[8].mxu1 %vm705_vm2, %v1631_v51 }
  0x59   : > { %1501 = vmatprep.mubr.msk.bf16.mxu0 %vm705_vm2, %v1632_v52  ;;  %1533 = vmatprep.mubr.msk.bf16.mxu1 %vm705_vm2, %v1633_v53 }
  0x60   : > { %1502 = vmatmul.mubr.msk.bf16.gmra.mrb[12].mxu0 %vm705_vm2, %v1634_v54  ;;  %1534 = vmatmul.mubr.msk.bf16.gmra.mrb[12].mxu1 %vm705_vm2, %v1635_v55 }
  0x61   : > { %1505 = vmatprep.mubr.msk.bf16.mxu0 %vm705_vm2, %v1636_v56  ;;  %1537 = vmatprep.mubr.msk.bf16.mxu1 %vm705_vm2, %v1637_v57 }
  0x68   : > { %1506 = vmatmul.mubr.msk.bf16.gmra.mrb[16].mxu0 %vm705_vm2, %v1638_v58  ;;  %1538 = vmatmul.mubr.msk.bf16.gmra.mrb[16].mxu1 %vm705_vm2, %v1639_v59 }
  0x69   : > { %1509 = vmatprep.mubr.msk.bf16.mxu0 %vm705_vm2, %v1640_v60  ;;  %1541 = vmatprep.mubr.msk.bf16.mxu1 %vm705_vm2, %v1641_v61 }
  0x70   : > { %1510 = vmatmul.mubr.msk.bf16.gmra.mrb[20].mxu0 %vm705_vm2, %v1642_v62  ;;  %1542 = vmatmul.mubr.msk.bf16.gmra.mrb[20].mxu1 %vm705_vm2, %v1643_v63 }
  0x71   : > { %1513 = vmatprep.mubr.msk.bf16.mxu0 %vm705_vm2, %v1644_v0  ;;  %1545 = vmatprep.mubr.msk.bf16.mxu1 %vm705_vm2, %v1645_v1 }
  0x78   : > { %1514 = vmatmul.mubr.msk.bf16.gmra.mrb[24].mxu0 %vm705_vm2, %v1646_v2  ;;  %1546 = vmatmul.mubr.msk.bf16.gmra.mrb[24].mxu1 %vm705_vm2, %v1647_v3 }
  0x79   : > { %1517 = vmatprep.mubr.msk.bf16.mxu0 %vm705_vm2, %v1648_v4  ;;  %1549 = vmatprep.mubr.msk.bf16.mxu1 %vm705_vm2, %v1649_v5 }
  0x80   : > { %1518 = vmatmul.mubr.msk.bf16.gmra.mrb[28].mxu0 %vm705_vm2, %v1650_v6  ;;  %1550 = vmatmul.mubr.msk.bf16.gmra.mrb[28].mxu1 %vm705_vm2, %v1651_v7 }
 0x11b   : > { %v1491_v8 = vpop.f32.mrb[0].mxu0  ;;  %v1523_v9 = vpop.f32.mrb[0].mxu1 }
 0x11c   : > { %v843_v10 = vpop.f32.mrb[1].mxu0  ;;  %v971_v11 = vpop.f32.mrb[1].mxu1  ;;  %v1132_v17 = vmax.f32 %v1523_v9, 0.0  ;;  %v1100_v21 = vmax.f32 %v1491_v8, 0.0 }
 0x11d   : > { %v1130_v12 = vmax.f32 %v971_v11, 0.0  ;;  %v1492_v13 = vpop.f32.mrb[2].mxu0  ;;  %v1524_v14 = vpop.f32.mrb[2].mxu1  ;;  %v1098_v18 = vmax.f32 %v843_v10, 0.0 }
 0x11e   : > { %v846_v15 = vpop.f32.mrb[3].mxu0  ;;  %v974_v16 = vpop.f32.mrb[3].mxu1  ;;  %v1101_v24 = vmax.f32 %v1492_v13, 0.0  ;;  %v1133_v25 = vmax.f32 %v1524_v14, 0.0 }
 0x11f   : > { %v1099_v19 = vmax.f32 %v846_v15, 0.0  ;;  %v1131_v20 = vmax.f32 %v974_v16, 0.0 }
 0x121   : > { %v1163_v22 = vadd.f32 %v1099_v19, %v1098_v18  ;;  %v1215_v23 = vadd.f32 %v1131_v20, %v1130_v12 }
 0x123   : > { %v1164_v26 = vadd.f32 %v1163_v22, %v1100_v21  ;;  %v1216_v27 = vadd.f32 %v1215_v23, %v1132_v17  ;;  %v1495_v28 = vpop.f32.mrb[4].mxu0  ;;  %v1527_v29 = vpop.f32.mrb[4].mxu1 }
 0x124   : > { %v859_v30 = vpop.f32.mrb[5].mxu0  ;;  %v987_v31 = vpop.f32.mrb[5].mxu1  ;;  %v1136_v38 = vmax.f32 %v1527_v29, 0.0  ;;  %v1104_v45 = vmax.f32 %v1495_v28, 0.0 }
 0x125   : > { %v1102_v32 = vmax.f32 %v859_v30, 0.0  ;;  %v1165_v33 = vadd.f32 %v1164_v26, %v1101_v24  ;;  %v1134_v34 = vmax.f32 %v987_v31, 0.0  ;;  %v1217_v35 = vadd.f32 %v1216_v27, %v1133_v25  ;;  %v1496_v36 = vpop.f32.mrb[6].mxu0  ;;  %v1528_v37 = vpop.f32.mrb[6].mxu1 }
 0x126   : > { %v862_v39 = vpop.f32.mrb[7].mxu0  ;;  %v990_v40 = vpop.f32.mrb[7].mxu1  ;;  %v1105_v48 = vmax.f32 %v1496_v36, 0.0  ;;  %v1137_v49 = vmax.f32 %v1528_v37, 0.0 }
 0x127   : > { %v1166_v41 = vadd.f32 %v1165_v33, %v1102_v32  ;;  %v1218_v42 = vadd.f32 %v1217_v35, %v1134_v34  ;;  %v1103_v43 = vmax.f32 %v862_v39, 0.0  ;;  %v1135_v44 = vmax.f32 %v990_v40, 0.0 }
 0x129   : > { %v1167_v46 = vadd.f32 %v1166_v41, %v1103_v43  ;;  %v1219_v47 = vadd.f32 %v1218_v42, %v1135_v44 }
 0x12b   : > { %v1168_v50 = vadd.f32 %v1167_v46, %v1104_v45  ;;  %v1220_v51 = vadd.f32 %v1219_v47, %v1136_v38  ;;  %v1499_v52 = vpop.f32.mrb[8].mxu0  ;;  %v1531_v53 = vpop.f32.mrb[8].mxu1 }
 0x12c   : > { %v875_v54 = vpop.f32.mrb[9].mxu0  ;;  %v1003_v55 = vpop.f32.mrb[9].mxu1  ;;  %v1140_v63 = vmax.f32 %v1531_v53, 0.0  ;;  %v1108_v3 = vmax.f32 %v1499_v52, 0.0 }
 0x12d   : > { %v1169_v56 = vadd.f32 %v1168_v50, %v1105_v48  ;;  %v1940_v57 = vadd.f32 %v1220_v51, %v1137_v49  ;;  %v1138_v58 = vmax.f32 %v1003_v55, 0.0  ;;  %v1500_v59 = vpop.f32.mrb[10].mxu0  ;;  %v1532_v60 = vpop.f32.mrb[10].mxu1  ;;  %v1106_v0 = vmax.f32 %v875_v54, 0.0 }
 0x12e   : > { %v878_v61 = vpop.f32.mrb[11].mxu0  ;;  %v1006_v62 = vpop.f32.mrb[11].mxu1  ;;  %v1109_v6 = vmax.f32 %v1500_v59, 0.0  ;;  %v1141_v12 = vmax.f32 %v1532_v60, 0.0 }
 0x12f   : > { %v1107_v1 = vmax.f32 %v878_v61, 0.0  ;;  %v1139_v2 = vmax.f32 %v1006_v62, 0.0  ;;  %v1170_v11 = vrot.slane %v1169_v56, 4 }
 0x131   : > { %v1176_v4 = vadd.f32 %v1107_v1, %v1106_v0  ;;  %v1228_v5 = vadd.f32 %v1139_v2, %v1138_v58  ;;  %v1171_v25 = vadd.f32 %v1170_v11, %v1169_v56 }
 0x133   : > { %v1177_v7 = vadd.f32 %v1176_v4, %v1108_v3  ;;  %v1229_v8 = vadd.f32 %v1228_v5, %v1140_v63  ;;  %v1503_v9 = vpop.f32.mrb[12].mxu0  ;;  %v1535_v10 = vpop.f32.mrb[12].mxu1  ;;  %v1172_v36 = vrot.slane %v1171_v25, 2 }
 0x134   : > { %v891_v13 = vpop.f32.mrb[13].mxu0  ;;  %v1019_v14 = vpop.f32.mrb[13].mxu1  ;;  %v1144_v26 = vmax.f32 %v1535_v10, 0.0  ;;  %v1112_v29 = vmax.f32 %v1503_v9, 0.0 }
 0x135   : > { %v1110_v15 = vmax.f32 %v891_v13, 0.0  ;;  %v1178_v16 = vadd.f32 %v1177_v7, %v1109_v6  ;;  %v1504_v17 = vpop.f32.mrb[14].mxu0  ;;  %v1536_v18 = vpop.f32.mrb[14].mxu1  ;;  %v1142_v19 = vmax.f32 %v1019_v14, 0.0  ;;  %v1230_v20 = vadd.f32 %v1229_v8, %v1141_v12 }
 0x136   : > { %v894_v21 = vpop.f32.mrb[15].mxu0  ;;  %v1022_v22 = vpop.f32.mrb[15].mxu1  ;;  %v1113_v32 = vmax.f32 %v1504_v17, 0.0  ;;  %v1145_v37 = vmax.f32 %v1536_v18, 0.0  ;;  %v1173_v53 = vadd.f32 %v1172_v36, %v1171_v25 }
 0x137   : > { %v1179_v23 = vadd.f32 %v1178_v16, %v1110_v15  ;;  %v1111_v24 = vmax.f32 %v894_v21, 0.0  ;;  %v1231_v27 = vadd.f32 %v1230_v20, %v1142_v19  ;;  %v1143_v28 = vmax.f32 %v1022_v22, 0.0 }
 0x138   : > { %v1174_v1 = vrot.slane %v1173_v53, 1 }
 0x139   : > { %v1180_v30 = vadd.f32 %v1179_v23, %v1111_v24  ;;  %v1232_v31 = vadd.f32 %v1231_v27, %v1143_v28 }
 0x13a   : > { %v1175_v20 = vadd.f32 %v1174_v1, %v1173_v53 }
 0x13b   : > { %v1181_v33 = vadd.f32 %v1180_v30, %v1112_v29  ;;  %v1507_v34 = vpop.f32.mrb[16].mxu0  ;;  %v1539_v35 = vpop.f32.mrb[16].mxu1  ;;  %v1233_v38 = vadd.f32 %v1232_v31, %v1144_v26 }
 0x13c   : > { %v907_v39 = vpop.f32.mrb[17].mxu0  ;;  %v1035_v40 = vpop.f32.mrb[17].mxu1  ;;  %v1148_v46 = vmax.f32 %v1539_v35, 0.0  ;;  %v1116_v55 = vmax.f32 %v1507_v34, 0.0 }
 0x13d   : > { %v1182_v41 = vadd.f32 %v1181_v33, %v1113_v32  ;;  %v1146_v42 = vmax.f32 %v1035_v40, 0.0  ;;  %v1508_v43 = vpop.f32.mrb[18].mxu0  ;;  %v1540_v44 = vpop.f32.mrb[18].mxu1  ;;  %v1942_v45 = vadd.f32 %v1233_v38, %v1145_v37  ;;  %v1114_v50 = vmax.f32 %v907_v39, 0.0 }
 0x13e   : > { %v910_v47 = vpop.f32.mrb[19].mxu0  ;;  %v1038_v48 = vpop.f32.mrb[19].mxu1  ;;  %v1117_v60 = vmax.f32 %v1508_v43, 0.0  ;;  %v1149_v2 = vmax.f32 %v1540_v44, 0.0 }
 0x13f   : > { %v1183_v49 = vrot.slane %v1182_v41, 4  ;;  %v1115_v51 = vmax.f32 %v910_v47, 0.0  ;;  %v1147_v52 = vmax.f32 %v1038_v48, 0.0 }
 0x141   : > { %v1184_v54 = vadd.f32 %v1183_v49, %v1182_v41  ;;  %v1189_v56 = vadd.f32 %v1115_v51, %v1114_v50  ;;  %v1241_v58 = vadd.f32 %v1147_v52, %v1146_v42 }
 0x143   : > { %v1185_v59 = vrot.slane %v1184_v54, 2  ;;  %v1190_v61 = vadd.f32 %v1189_v56, %v1116_v55  ;;  %v1242_v62 = vadd.f32 %v1241_v58, %v1148_v46  ;;  %v1511_v63 = vpop.f32.mrb[20].mxu0  ;;  %v1543_v0 = vpop.f32.mrb[20].mxu1 }
 0x144   : > { %v923_v3 = vpop.f32.mrb[21].mxu0  ;;  %v1051_v4 = vpop.f32.mrb[21].mxu1  ;;  %v1152_v18 = vmax.f32 %v1543_v0, 0.0  ;;  %v1120_v22 = vmax.f32 %v1511_v63, 0.0 }
 0x145   : > { %v1186_v5 = vadd.f32 %v1185_v59, %v1184_v54  ;;  %v1118_v6 = vmax.f32 %v923_v3, 0.0  ;;  %v1191_v7 = vadd.f32 %v1190_v61, %v1117_v60  ;;  %v1150_v8 = vmax.f32 %v1051_v4, 0.0  ;;  %v1512_v9 = vpop.f32.mrb[22].mxu0  ;;  %v1544_v10 = vpop.f32.mrb[22].mxu1 }
 0x146   : > { %v1243_v11 = vadd.f32 %v1242_v62, %v1149_v2  ;;  %v926_v12 = vpop.f32.mrb[23].mxu0  ;;  %v1054_v13 = vpop.f32.mrb[23].mxu1  ;;  %v1121_v26 = vmax.f32 %v1512_v9, 0.0  ;;  %v1153_v30 = vmax.f32 %v1544_v10, 0.0  ;;  %v1222_v3 = vrot.slane %v1940_v57, 4 }
 0x147   : > { %v1187_v14 = vrot.slane %v1186_v5, 1  ;;  %v1192_v15 = vadd.f32 %v1191_v7, %v1118_v6  ;;  %v1119_v16 = vmax.f32 %v926_v12, 0.0  ;;  %v1151_v17 = vmax.f32 %v1054_v13, 0.0 }
 0x148   : > { %v1244_v19 = vadd.f32 %v1243_v11, %v1150_v8  ;;  %v1235_v4 = vrot.slane %v1942_v45, 4 }
 0x149   : > { %v1188_v21 = vadd.f32 %v1187_v14, %v1186_v5  ;;  %v1193_v23 = vadd.f32 %v1192_v15, %v1119_v16 }
 0x14a   : > { %v1245_v24 = vadd.f32 %v1244_v19, %v1151_v17 }
 0x14b   : > { %v1276_v25 = vsel %vm1275_vm3, %v1188_v21, %v1175_v20  ;;  %v1194_v27 = vadd.f32 %v1193_v23, %v1120_v22  ;;  %v1515_v28 = vpop.f32.mrb[24].mxu0  ;;  %v1547_v29 = vpop.f32.mrb[24].mxu1  ;;  %v1236_v20 = vadd.f32 %v1235_v4, %v1942_v45 }
 0x14c   : > { %v1246_v31 = vadd.f32 %v1245_v24, %v1152_v18  ;;  %v939_v32 = vpop.f32.mrb[25].mxu0  ;;  %v1067_v33 = vpop.f32.mrb[25].mxu1  ;;  %v1156_v39 = vmax.f32 %v1547_v29, 0.0  ;;  %v1124_v48 = vmax.f32 %v1515_v28, 0.0  ;;  %v1223_v18 = vadd.f32 %v1222_v3, %v1940_v57 }
 0x14d   : > { %v1195_v34 = vadd.f32 %v1194_v27, %v1121_v26  ;;  %v1154_v35 = vmax.f32 %v1067_v33, 0.0  ;;  %v1516_v36 = vpop.f32.mrb[26].mxu0  ;;  %v1548_v37 = vpop.f32.mrb[26].mxu1  ;;  %v1122_v43 = vmax.f32 %v939_v32, 0.0 }
 0x14e   : > { %v1247_v38 = vadd.f32 %v1246_v31, %v1153_v30  ;;  %v942_v40 = vpop.f32.mrb[27].mxu0  ;;  %v1070_v41 = vpop.f32.mrb[27].mxu1  ;;  %v1125_v52 = vmax.f32 %v1516_v36, 0.0  ;;  %v1157_v58 = vmax.f32 %v1548_v37, 0.0  ;;  %v1224_v29 = vrot.slane %v1223_v18, 2 }
 0x14f   : > { %v1196_v42 = vrot.slane %v1195_v34, 4  ;;  %v1123_v44 = vmax.f32 %v942_v40, 0.0  ;;  %v1155_v46 = vmax.f32 %v1070_v41, 0.0  ;;  %v1237_v31 = vrot.slane %v1236_v20, 2 }
 0x150   : > { %v1248_v12 = vrot.slane %v1247_v38, 4  ;;  %v1225_v36 = vadd.f32 %v1224_v29, %v1223_v18 }
 0x151   : > { %v1197_v47 = vadd.f32 %v1196_v42, %v1195_v34  ;;  %v1202_v49 = vadd.f32 %v1123_v44, %v1122_v43  ;;  %v1254_v50 = vadd.f32 %v1155_v46, %v1154_v35  ;;  %v1238_v57 = vadd.f32 %v1237_v31, %v1236_v20 }
 0x152   : > { %v1249_v24 = vadd.f32 %v1248_v12, %v1247_v38  ;;  %v1226_v41 = vrot.slane %v1225_v36, 1 }
 0x153   : > { %v1198_v51 = vrot.slane %v1197_v47, 2  ;;  %v1203_v53 = vadd.f32 %v1202_v49, %v1124_v48  ;;  %v1255_v54 = vadd.f32 %v1254_v50, %v1156_v39  ;;  %v1519_v55 = vpop.f32.mrb[28].mxu0  ;;  %v1551_v56 = vpop.f32.mrb[28].mxu1  ;;  %v1239_v38 = vrot.slane %v1238_v57, 1 }
 0x154   : > { %v955_v59 = vpop.f32.mrb[29].mxu0  ;;  %v1083_v60 = vpop.f32.mrb[29].mxu1  ;;  %v1160_v13 = vmax.f32 %v1551_v56, 0.0  ;;  %v1128_v16 = vmax.f32 %v1519_v55, 0.0  ;;  %v1250_v33 = vrot.slane %v1249_v24, 2  ;;  %v1227_v48 = vadd.f32 %v1226_v41, %v1225_v36 }
 0x155   : > { %v1199_v61 = vadd.f32 %v1198_v51, %v1197_v47  ;;  %v1126_v62 = vmax.f32 %v955_v59, 0.0  ;;  %v1204_v63 = vadd.f32 %v1203_v53, %v1125_v52  ;;  %v1158_v0 = vmax.f32 %v1083_v60, 0.0  ;;  %v1520_v1 = vpop.f32.mrb[30].mxu0  ;;  %v1552_v2 = vpop.f32.mrb[30].mxu1  ;;  %v1162_v53 = vld [vmem:[%s1861_s19] sm:$0xff] }
 0x156   : > { %v1256_v5 = vadd.f32 %v1255_v54, %v1157_v58  ;;  %v958_v6 = vpop.f32.mrb[31].mxu0  ;;  %v1086_v7 = vpop.f32.mrb[31].mxu1  ;;  %v1129_v22 = vmax.f32 %v1520_v1, 0.0  ;;  %v1161_v26 = vmax.f32 %v1552_v2, 0.0  ;;  %v1251_v40 = vadd.f32 %v1250_v33, %v1249_v24 }
 0x157   : > { %v1200_v8 = vrot.slane %v1199_v61, 1  ;;  %v1205_v9 = vadd.f32 %v1204_v63, %v1126_v62  ;;  %v1127_v10 = vmax.f32 %v958_v6, 0.0  ;;  %v1159_v11 = vmax.f32 %v1086_v7, 0.0 }
 0x158   : > { %v1257_v14 = vadd.f32 %v1256_v5, %v1158_v0  ;;  %v1252_v44 = vrot.slane %v1251_v40, 1  ;;  %v1240_v49 = vadd.f32 %v1239_v38, %v1238_v57 }
 0x159   : > { %v1201_v15 = vadd.f32 %v1200_v8, %v1199_v61  ;;  %v1206_v17 = vadd.f32 %v1205_v9, %v1127_v10 }
 0x15a   : > { %v1258_v19 = vadd.f32 %v1257_v14, %v1159_v11  ;;  %v1253_v51 = vadd.f32 %v1252_v44, %v1251_v40 }
 0x15b   : > { %v1278_v21 = vsel %vm1277_vm4, %v1201_v15, %v1276_v25  ;;  %v1207_v23 = vadd.f32 %v1206_v17, %v1128_v16 }
 0x15c   : > { %v1259_v27 = vadd.f32 %v1258_v19, %v1160_v13 }
 0x15d   : > { %v1208_v28 = vadd.f32 %v1207_v23, %v1129_v22 }
 0x15e   : > { %v1260_v30 = vadd.f32 %v1259_v27, %v1161_v26 }
 0x15f   : > { %v1209_v32 = vrot.slane %v1208_v28, 4 }
 0x160   : > { %v1261_v34 = vrot.slane %v1260_v30, 4 }
 0x161   : > { %v1210_v35 = vadd.f32 %v1209_v32, %v1208_v28 }
 0x162   : > { %v1262_v37 = vadd.f32 %v1261_v34, %v1260_v30 }
 0x163   : > { %v1211_v39 = vrot.slane %v1210_v35, 2 }
 0x164   : > { %v1263_v45 = vrot.slane %v1262_v37, 2 }
 0x165   : > { %v1212_v25 = vadd.f32 %v1211_v39, %v1210_v35 }
 0x166   : > { %v1264_v42 = vadd.f32 %v1263_v45, %v1262_v37 }
 0x167   : > { %v1213_v43 = vrot.slane %v1212_v25, 1 }
 0x168   : > { %v1265_v47 = vrot.slane %v1264_v42, 1 }
 0x169   : > { %v1214_v46 = vadd.f32 %v1213_v43, %v1212_v25 }
 0x16a   : > { %v1266_v54 = vadd.f32 %v1265_v47, %v1264_v42 }
 0x16b   : > { %v1280_v50 = vsel %vm1279_vm5, %v1214_v46, %v1278_v21 }
 0x16c   : > { %v1282_v52 = vsel %vm1281_vm6, %v1227_v48, %v1280_v50 }
 0x16d   : > { %v1284_v55 = vsel %vm1283_vm7, %v1240_v49, %v1282_v52 }
 0x16e   : > { %v1286_v56 = vsel %vm1285_vm8, %v1253_v51, %v1284_v55 }
 0x16f   : > { %v1288_v58 = vsel %vm1287_vm9, %v1266_v54, %v1286_v56 }
 0x170   : > { %v1290_v59 = vadd.f32 %v1288_v58, %v1162_v53 }
 0x172   : > { %1291 = vst [vmem:[%s1861_s19] sm:$0xff] %v1290_v59 }
 0x173 PF: > { %s12_s15 = sadd.s32 1, %s1706_s15   ;;  %s1974_s9 = smov %s1686_s10 }
 0x174   : > { %p9_p12 = scmp.ge.s32.totalorder %s12_s15, 10   ;;  %s1975_s10 = smov %s1776_s22 }
 0x175   : > { %s1976_s11 = smov %s1698_s13  ;;  %s1977_s12 = smov %s1702_s14 }
 0x176   : > { %s1978_s13 = smov %s1981_s16  ;;  %s1979_s14 = smov %s1985_s17 }
 0x177   :  { %11 = sbr.rel (!%p9_p12) target bundleno = 4 (0x4), region = 108 }

</bundles_post_ra>
